<compile_context>
chip_gen: v7x
topology: tpu7x:2x2x1
jax: 0.10.0
libtpu: 0.0.40
codegen_flags: <defaults>
</compile_context>

<pallas_src>
import functools

import jax
import jax.numpy as jnp
from jax.experimental import pallas as pl
from jax.experimental.pallas import tpu as pltpu

LANE = 128


def _round_up(n, m):
    return ((n + m - 1) // m) * m


def _pad2(a, rows, cols):
    r, c = a.shape
    return jnp.pad(a, ((0, rows - r), (0, cols - c)))


def _vae_kernel(x_ref, eps_ref,
                w1_ref, b1_ref, w2_ref, b2_ref, wh_ref, bh_ref,
                wd1_ref, bd1_ref, wd2_ref, bd2_ref, wd3_ref, bd3_ref,
                dec_ref, lat_ref, *, lp):
    f32 = jnp.float32

    def dense(a, w_ref, b_ref, relu):
        # Cast activations to the weight dtype (no-op for f32, enables bf16
        # MXU inputs on v6e/v7x) and accumulate in f32.
        y = jnp.dot(a.astype(w_ref.dtype), w_ref[...],
                    preferred_element_type=f32) + b_ref[...].astype(f32)
        return jnp.maximum(y, 0.0) if relu else y

    x = x_ref[...]

    # ---- encoder: Linear(Dp,256)+ReLU, Linear(256,128)+ReLU (64 padded) ----
    h = dense(x, w1_ref, b1_ref, relu=True)
    h = dense(h, w2_ref, b2_ref, relu=True)

    # ---- fused latent heads: one matmul producing [mu | logvar] ----
    heads = dense(h, wh_ref, bh_ref, relu=False)
    mu = heads[:, :lp]
    logvar = heads[:, lp:]

    # ---- reparameterization: z = mu + exp(0.5*logvar) * eps ----
    # (padded lanes: mu=0, logvar=0 -> std=1, eps=0 -> z=0, stays exact)
    z = mu + jnp.exp(0.5 * logvar) * eps_ref[...]

    # ---- decoder: Linear(Lp,128)+ReLU, Linear(128,256)+ReLU, Linear(256,Dp) --
    d = dense(z, wd1_ref, bd1_ref, relu=True)
    d = dense(d, wd2_ref, bd2_ref, relu=True)
    dec = dense(d, wd3_ref, bd3_ref, relu=False)

    dec_ref[...] = dec
    # Lane-dense packed latent slab [mu | logvar | z]; all offsets are
    # multiples of 128, so every store is a full unmasked vst.
    lat_ref[:, 0:lp] = mu
    lat_ref[:, lp:2 * lp] = logvar
    lat_ref[:, 2 * lp:3 * lp] = z


def vae_forward(x, eps, params, *, batch_tile=None, weight_dtype=None):
    """Fused VAE forward.  x: [B, D] f32, eps: [B, L] f32.

    Returns (decoded [B,D], mu [B,L], logvar [B,L], z [B,L]) in f32.
    """
    B, D = x.shape
    L = eps.shape[1]
    (w1, b1, w2, b2, wmu, bmu, wlv, blv,
     wd1, bd1, wd2, bd2, wd3, bd3) = params

    Dp = _round_up(D, LANE)     # padded input dim
    Lp = _round_up(L, LANE)     # padded latent dim
    H1 = 256                    # already lane aligned
    H2 = LANE                   # hidden 64 padded to 128

    # ---- pack / zero-pad parameters (padding with zeros is exact) ----
    w1p = _pad2(w1, Dp, H1); b1p = _pad2(b1, 1, H1)
    w2p = _pad2(w2, H1, H2); b2p = _pad2(b2, 1, H2)
    # fused mu/logvar head -> (H2, 2*Lp): [wmu | wlv] at 128-aligned offsets
    whp = jnp.zeros((H2, 2 * Lp), w1.dtype)
    whp = whp.at[:wmu.shape[0], :L].set(wmu)
    whp = whp.at[:wlv.shape[0], Lp:Lp + L].set(wlv)
    bhp = jnp.zeros((1, 2 * Lp), w1.dtype)
    bhp = bhp.at[:, :L].set(bmu)
    bhp = bhp.at[:, Lp:Lp + L].set(blv)
    wd1p = _pad2(wd1, Lp, H2); bd1p = _pad2(bd1, 1, H2)
    wd2p = _pad2(wd2, H2, H1); bd2p = _pad2(bd2, 1, H1)
    wd3p = _pad2(wd3, H1, Dp); bd3p = _pad2(bd3, 1, Dp)

    weights = [w1p, b1p, w2p, b2p, whp, bhp,
               wd1p, bd1p, wd2p, bd2p, wd3p, bd3p]
    if weight_dtype is not None:
        # bf16 weights + f32 accumulation recommended on v6e/v7x.
        weights = [w.astype(weight_dtype) for w in weights]

    # ---- batch tiling: large tiles; whole batch in one step when B small ---
    if batch_tile is None:
        tb = 256 if B >= 512 else _round_up(B, 8)
    else:
        tb = _round_up(batch_tile, 8)
    Bp = _round_up(B, tb)
    grid = (Bp // tb,)

    xp = _pad2(x, Bp, Dp)
    epsp = _pad2(eps, Bp, Lp)

    def batch_spec(width):
        return pl.BlockSpec((tb, width), lambda i: (i, 0))

    def full_spec(a):
        # Constant index_map: block never changes, so it is DMA'd only once.
        return pl.BlockSpec(a.shape, lambda i: (0, 0))

    in_specs = [batch_spec(Dp), batch_spec(Lp)] + [full_spec(w) for w in weights]
    out_specs = [batch_spec(Dp), batch_spec(3 * Lp)]
    out_shape = (jax.ShapeDtypeStruct((Bp, Dp), jnp.float32),
                 jax.ShapeDtypeStruct((Bp, 3 * Lp), jnp.float32))

    # ---- cost estimate (advisory, helps XLA schedule the custom call) ----
    flops = 2 * Bp * (Dp * H1 + H1 * H2 + H2 * (2 * Lp)
                      + Lp * H2 + H2 * H1 + H1 * Dp)
    wt_bytes = sum(int(w.size) * w.dtype.itemsize for w in weights)
    bytes_accessed = int((xp.size + epsp.size) * 4 + wt_bytes
                         + (Bp * Dp + Bp * 3 * Lp) * 4)
    cost = pl.CostEstimate(flops=int(flops),
                           transcendentals=int(Bp * Lp),
                           bytes_accessed=bytes_accessed)

    # ---- VMEM budget (double-buffered batch tiles + weights), v7x-safe ----
    act_bytes = tb * (Dp + Lp + Dp + 3 * Lp) * 4
    vmem_needed = 2 * act_bytes + 2 * wt_bytes
    vmem_limit = int(min(max(vmem_needed * 2, 32 * 1024 * 1024),
                         64 * 1024 * 1024))

    dec_p, lat_p = pl.pallas_call(
        functools.partial(_vae_kernel, lp=Lp),
        out_shape=out_shape,
        grid_spec=pltpu.PrefetchScalarGridSpec(
            num_scalar_prefetch=0,
            grid=grid,
            in_specs=in_specs,
            out_specs=out_specs),
        compiler_params=pltpu.CompilerParams(
            dimension_semantics=("parallel",),
            vmem_limit_bytes=vmem_limit),
        cost_estimate=cost,
    )(xp, epsp, *weights)

    decoded = dec_p[:B, :D]
    mu = lat_p[:B, 0:L]
    logvar = lat_p[:B, Lp:Lp + L]
    z = lat_p[:B, 2 * Lp:2 * Lp + L]
    return decoded, mu, logvar, z


def init_vae_params(key, input_dim, latent_dim):
    """Deterministic init. Weights already transposed to (in, out)."""
    dims = [
        (input_dim, 256),   # encoder.0
        (256, 64),          # encoder.2
        (64, latent_dim),   # mu_layer
        (64, latent_dim),   # logvar_layer
        (latent_dim, 64),   # decoder.0
        (64, 256),          # decoder.2
        (256, input_dim),   # decoder.4
    ]
    params = []
    for (fan_in, fan_out) in dims:
        key, kw, kb = jax.random.split(key, 3)
        bound = 1.0 / jnp.sqrt(fan_in)
        w = jax.random.uniform(kw, (fan_in, fan_out), jnp.float32, -bound, bound)
        b = jax.random.uniform(kb, (1, fan_out), jnp.float32, -bound, bound)
        params += [w, b]
    return tuple(params)


def vae_forward_ref(x, eps, params):
    """Plain-JAX reference (unpadded, unfused) for correctness checking."""
    (w1, b1, w2, b2, wmu, bmu, wlv, blv,
     wd1, bd1, wd2, bd2, wd3, bd3) = params
    relu = lambda a: jnp.maximum(a, 0.0)
    h = relu(x @ w1 + b1)
    h = relu(h @ w2 + b2)
    mu = h @ wmu + bmu
    logvar = h @ wlv + blv
    z = mu + jnp.exp(0.5 * logvar) * eps
    d = relu(z @ wd1 + bd1)
    d = relu(d @ wd2 + bd2)
    dec = d @ wd3 + bd3
    return dec, mu, logvar, z


if __name__ == "__main__":
    B, D, L = 16, 32, 8   # batch, input_dim, latent_dim (small demo shapes)

    key = jax.random.PRNGKey(0)
    kx, keps, kparams = jax.random.split(key, 3)

    x = jax.random.normal(kx, (B, D), jnp.float32)
    # torch.randn_like(std) -> epsilon is drawn outside the kernel.
    eps = jax.random.normal(keps, (B, L), jnp.float32)
    params = init_vae_params(kparams, D, L)

    decoded, mu, logvar, z = jax.block_until_ready(
        vae_forward(x, eps, params))

    dec_r, mu_r, lv_r, z_r = vae_forward_ref(x, eps, params)
    assert jnp.allclose(decoded, dec_r, atol=1e-4, rtol=1e-4)
    assert jnp.allclose(mu, mu_r, atol=1e-4, rtol=1e-4)
    assert jnp.allclose(logvar, lv_r, atol=1e-4, rtol=1e-4)
    assert jnp.allclose(z, z_r, atol=1e-4, rtol=1e-4)

    print("KERNEL_OK")
</pallas_src>

<mosaic_0001>
module attributes {stable_mosaic.version = 11 : i64} {
  func.func @_vae_kernel(%arg0: i32, %arg1: memref<16x128xf32, #tpu.memory_space<vmem>>, %arg2: memref<16x128xf32, #tpu.memory_space<vmem>>, %arg3: memref<128x256xf32, #tpu.memory_space<vmem>>, %arg4: memref<1x256xf32, #tpu.memory_space<vmem>>, %arg5: memref<256x128xf32, #tpu.memory_space<vmem>>, %arg6: memref<1x128xf32, #tpu.memory_space<vmem>>, %arg7: memref<128x256xf32, #tpu.memory_space<vmem>>, %arg8: memref<1x256xf32, #tpu.memory_space<vmem>>, %arg9: memref<128x128xf32, #tpu.memory_space<vmem>>, %arg10: memref<1x128xf32, #tpu.memory_space<vmem>>, %arg11: memref<128x256xf32, #tpu.memory_space<vmem>>, %arg12: memref<1x256xf32, #tpu.memory_space<vmem>>, %arg13: memref<256x128xf32, #tpu.memory_space<vmem>>, %arg14: memref<1x128xf32, #tpu.memory_space<vmem>>, %arg15: memref<16x128xf32, #tpu.memory_space<vmem>>, %arg16: memref<16x384xf32, #tpu.memory_space<vmem>>) attributes {dimension_semantics = [#tpu.dimension_semantics<parallel>], iteration_bounds = array<i64: 1>, scalar_prefetch = 0 : i64, scratch_operands = 0 : i64, tpu.core_type = #tpu.core_type<tc>, window_params = [{transform_indices = @transform_0, window_bounds = array<i64: 16, 128>}, {transform_indices = @transform_1, window_bounds = array<i64: 16, 128>}, {pipeline_mode = #tpu.pipeline_mode<synchronous>, transform_indices = @transform_2, window_bounds = array<i64: 128, 256>}, {pipeline_mode = #tpu.pipeline_mode<synchronous>, transform_indices = @transform_3, window_bounds = array<i64: 1, 256>}, {pipeline_mode = #tpu.pipeline_mode<synchronous>, transform_indices = @transform_4, window_bounds = array<i64: 256, 128>}, {pipeline_mode = #tpu.pipeline_mode<synchronous>, transform_indices = @transform_5, window_bounds = array<i64: 1, 128>}, {pipeline_mode = #tpu.pipeline_mode<synchronous>, transform_indices = @transform_6, window_bounds = array<i64: 128, 256>}, {pipeline_mode = #tpu.pipeline_mode<synchronous>, transform_indices = @transform_7, window_bounds = array<i64: 1, 256>}, {pipeline_mode = #tpu.pipeline_mode<synchronous>, transform_indices = @transform_8, window_bounds = array<i64: 128, 128>}, {pipeline_mode = #tpu.pipeline_mode<synchronous>, transform_indices = @transform_9, window_bounds = array<i64: 1, 128>}, {pipeline_mode = #tpu.pipeline_mode<synchronous>, transform_indices = @transform_10, window_bounds = array<i64: 128, 256>}, {pipeline_mode = #tpu.pipeline_mode<synchronous>, transform_indices = @transform_11, window_bounds = array<i64: 1, 256>}, {pipeline_mode = #tpu.pipeline_mode<synchronous>, transform_indices = @transform_12, window_bounds = array<i64: 256, 128>}, {pipeline_mode = #tpu.pipeline_mode<synchronous>, transform_indices = @transform_13, window_bounds = array<i64: 1, 128>}, {transform_indices = @transform_14, window_bounds = array<i64: 16, 128>}, {transform_indices = @transform_15, window_bounds = array<i64: 16, 384>}]} {
    %c0 = arith.constant 0 : index
    %c0_0 = arith.constant 0 : index
    %0 = vector.load %arg1[%c0, %c0_0] : memref<16x128xf32, #tpu.memory_space<vmem>>, vector<16x128xf32>
    %c0_1 = arith.constant 0 : index
    %c0_2 = arith.constant 0 : index
    %1 = vector.load %arg3[%c0_1, %c0_2] : memref<128x256xf32, #tpu.memory_space<vmem>>, vector<128x256xf32>
    %cst = arith.constant dense<0.000000e+00> : vector<16x256xf32>
    %2 = tpu.matmul %0, %1, %cst {dimension_numbers = #tpu.dot_dimension_numbers<[1], [0], [0], [1], [0, 0, 1, 1], [], []>} : vector<16x128xf32>, vector<128x256xf32>, vector<16x256xf32> -> vector<16x256xf32>
    %c0_3 = arith.constant 0 : index
    %c0_4 = arith.constant 0 : index
    %3 = vector.load %arg4[%c0_3, %c0_4] : memref<1x256xf32, #tpu.memory_space<vmem>>, vector<1x256xf32>
    %4 = vector.broadcast %3 : vector<1x256xf32> to vector<16x256xf32>
    %5 = arith.addf %2, %4 : vector<16x256xf32>
    %cst_5 = arith.constant 0.000000e+00 : f32
    %6 = vector.broadcast %cst_5 : f32 to vector<16x256xf32>
    %7 = arith.maximumf %5, %6 : vector<16x256xf32>
    %c0_6 = arith.constant 0 : index
    %c0_7 = arith.constant 0 : index
    %8 = vector.load %arg5[%c0_6, %c0_7] : memref<256x128xf32, #tpu.memory_space<vmem>>, vector<256x128xf32>
    %cst_8 = arith.constant dense<0.000000e+00> : vector<16x128xf32>
    %9 = tpu.matmul %7, %8, %cst_8 {dimension_numbers = #tpu.dot_dimension_numbers<[1], [0], [0], [1], [0, 0, 1, 1], [], []>} : vector<16x256xf32>, vector<256x128xf32>, vector<16x128xf32> -> vector<16x128xf32>
    %c0_9 = arith.constant 0 : index
    %c0_10 = arith.constant 0 : index
    %10 = vector.load %arg6[%c0_9, %c0_10] : memref<1x128xf32, #tpu.memory_space<vmem>>, vector<1x128xf32>
    %11 = vector.broadcast %10 : vector<1x128xf32> to vector<16x128xf32>
    %12 = arith.addf %9, %11 : vector<16x128xf32>
    %cst_11 = arith.constant 0.000000e+00 : f32
    %13 = vector.broadcast %cst_11 : f32 to vector<16x128xf32>
    %14 = arith.maximumf %12, %13 : vector<16x128xf32>
    %c0_12 = arith.constant 0 : index
    %c0_13 = arith.constant 0 : index
    %15 = vector.load %arg7[%c0_12, %c0_13] : memref<128x256xf32, #tpu.memory_space<vmem>>, vector<128x256xf32>
    %cst_14 = arith.constant dense<0.000000e+00> : vector<16x256xf32>
    %16 = tpu.matmul %14, %15, %cst_14 {dimension_numbers = #tpu.dot_dimension_numbers<[1], [0], [0], [1], [0, 0, 1, 1], [], []>} : vector<16x128xf32>, vector<128x256xf32>, vector<16x256xf32> -> vector<16x256xf32>
    %c0_15 = arith.constant 0 : index
    %c0_16 = arith.constant 0 : index
    %17 = vector.load %arg8[%c0_15, %c0_16] : memref<1x256xf32, #tpu.memory_space<vmem>>, vector<1x256xf32>
    %18 = vector.broadcast %17 : vector<1x256xf32> to vector<16x256xf32>
    %19 = arith.addf %16, %18 : vector<16x256xf32>
    %20 = vector.extract_strided_slice %19 {offsets = [0, 0], sizes = [16, 128], strides = [1, 1]} : vector<16x256xf32> to vector<16x128xf32>
    %21 = vector.extract_strided_slice %19 {offsets = [0, 128], sizes = [16, 128], strides = [1, 1]} : vector<16x256xf32> to vector<16x128xf32>
    %cst_17 = arith.constant 5.000000e-01 : f32
    %22 = vector.broadcast %cst_17 : f32 to vector<16x128xf32>
    %23 = arith.mulf %22, %21 : vector<16x128xf32>
    %24 = math.exp %23 : vector<16x128xf32>
    %c0_18 = arith.constant 0 : index
    %c0_19 = arith.constant 0 : index
    %25 = vector.load %arg2[%c0_18, %c0_19] : memref<16x128xf32, #tpu.memory_space<vmem>>, vector<16x128xf32>
    %26 = arith.mulf %24, %25 : vector<16x128xf32>
    %27 = arith.addf %20, %26 : vector<16x128xf32>
    %c0_20 = arith.constant 0 : index
    %c0_21 = arith.constant 0 : index
    %28 = vector.load %arg9[%c0_20, %c0_21] : memref<128x128xf32, #tpu.memory_space<vmem>>, vector<128x128xf32>
    %cst_22 = arith.constant dense<0.000000e+00> : vector<16x128xf32>
    %29 = tpu.matmul %27, %28, %cst_22 {dimension_numbers = #tpu.dot_dimension_numbers<[1], [0], [0], [1], [0, 0, 1, 1], [], []>} : vector<16x128xf32>, vector<128x128xf32>, vector<16x128xf32> -> vector<16x128xf32>
    %c0_23 = arith.constant 0 : index
    %c0_24 = arith.constant 0 : index
    %30 = vector.load %arg10[%c0_23, %c0_24] : memref<1x128xf32, #tpu.memory_space<vmem>>, vector<1x128xf32>
    %31 = vector.broadcast %30 : vector<1x128xf32> to vector<16x128xf32>
    %32 = arith.addf %29, %31 : vector<16x128xf32>
    %cst_25 = arith.constant 0.000000e+00 : f32
    %33 = vector.broadcast %cst_25 : f32 to vector<16x128xf32>
    %34 = arith.maximumf %32, %33 : vector<16x128xf32>
    %c0_26 = arith.constant 0 : index
    %c0_27 = arith.constant 0 : index
    %35 = vector.load %arg11[%c0_26, %c0_27] : memref<128x256xf32, #tpu.memory_space<vmem>>, vector<128x256xf32>
    %cst_28 = arith.constant dense<0.000000e+00> : vector<16x256xf32>
    %36 = tpu.matmul %34, %35, %cst_28 {dimension_numbers = #tpu.dot_dimension_numbers<[1], [0], [0], [1], [0, 0, 1, 1], [], []>} : vector<16x128xf32>, vector<128x256xf32>, vector<16x256xf32> -> vector<16x256xf32>
    %c0_29 = arith.constant 0 : index
    %c0_30 = arith.constant 0 : index
    %37 = vector.load %arg12[%c0_29, %c0_30] : memref<1x256xf32, #tpu.memory_space<vmem>>, vector<1x256xf32>
    %38 = vector.broadcast %37 : vector<1x256xf32> to vector<16x256xf32>
    %39 = arith.addf %36, %38 : vector<16x256xf32>
    %cst_31 = arith.constant 0.000000e+00 : f32
    %40 = vector.broadcast %cst_31 : f32 to vector<16x256xf32>
    %41 = arith.maximumf %39, %40 : vector<16x256xf32>
    %c0_32 = arith.constant 0 : index
    %c0_33 = arith.constant 0 : index
    %42 = vector.load %arg13[%c0_32, %c0_33] : memref<256x128xf32, #tpu.memory_space<vmem>>, vector<256x128xf32>
    %cst_34 = arith.constant dense<0.000000e+00> : vector<16x128xf32>
    %43 = tpu.matmul %41, %42, %cst_34 {dimension_numbers = #tpu.dot_dimension_numbers<[1], [0], [0], [1], [0, 0, 1, 1], [], []>} : vector<16x256xf32>, vector<256x128xf32>, vector<16x128xf32> -> vector<16x128xf32>
    %c0_35 = arith.constant 0 : index
    %c0_36 = arith.constant 0 : index
    %44 = vector.load %arg14[%c0_35, %c0_36] : memref<1x128xf32, #tpu.memory_space<vmem>>, vector<1x128xf32>
    %45 = vector.broadcast %44 : vector<1x128xf32> to vector<16x128xf32>
    %46 = arith.addf %43, %45 : vector<16x128xf32>
    %c0_37 = arith.constant 0 : index
    %c0_38 = arith.constant 0 : index
    %47 = vector.load %arg15[%c0_37, %c0_38] : memref<16x128xf32, #tpu.memory_space<vmem>>, vector<16x128xf32>
    tpu.vector_store %arg15[%c0_37, %c0_38], %46 {strides = array<i32>} : memref<16x128xf32, #tpu.memory_space<vmem>>, vector<16x128xf32>,
    %c0_39 = arith.constant 0 : index
    %c0_40 = arith.constant 0 : index
    %48 = vector.load %arg16[%c0_39, %c0_40] : memref<16x384xf32, #tpu.memory_space<vmem>>, vector<16x128xf32>
    tpu.vector_store %arg16[%c0_39, %c0_40], %20 {strides = array<i32>} : memref<16x384xf32, #tpu.memory_space<vmem>>, vector<16x128xf32>,
    %c0_41 = arith.constant 0 : index
    %c128 = arith.constant 128 : index
    %49 = vector.load %arg16[%c0_41, %c128] : memref<16x384xf32, #tpu.memory_space<vmem>>, vector<16x128xf32>
    tpu.vector_store %arg16[%c0_41, %c128], %21 {strides = array<i32>} : memref<16x384xf32, #tpu.memory_space<vmem>>, vector<16x128xf32>,
    %c0_42 = arith.constant 0 : index
    %c256 = arith.constant 256 : index
    %50 = vector.load %arg16[%c0_42, %c256] : memref<16x384xf32, #tpu.memory_space<vmem>>, vector<16x128xf32>
    tpu.vector_store %arg16[%c0_42, %c256], %27 {strides = array<i32>} : memref<16x384xf32, #tpu.memory_space<vmem>>, vector<16x128xf32>,
    return
  }
  func.func @transform_0(%arg0: i32) -> (i32, i32) {
    %c0_i32 = arith.constant 0 : i32
    %c0_i32_0 = arith.constant 0 : i32
    return %arg0, %c0_i32 : i32, i32
  }
  func.func @transform_1(%arg0: i32) -> (i32, i32) {
    %c0_i32 = arith.constant 0 : i32
    %c0_i32_0 = arith.constant 0 : i32
    return %arg0, %c0_i32 : i32, i32
  }
  func.func @transform_2(%arg0: i32) -> (i32, i32) {
    %c0_i32 = arith.constant 0 : i32
    %c0_i32_0 = arith.constant 0 : i32
    %c0_i32_1 = arith.constant 0 : i32
    return %c0_i32, %c0_i32_0 : i32, i32
  }
  func.func @transform_3(%arg0: i32) -> (i32, i32) {
    %c0_i32 = arith.constant 0 : i32
    %c0_i32_0 = arith.constant 0 : i32
    %c0_i32_1 = arith.constant 0 : i32
    return %c0_i32, %c0_i32_0 : i32, i32
  }
  func.func @transform_4(%arg0: i32) -> (i32, i32) {
    %c0_i32 = arith.constant 0 : i32
    %c0_i32_0 = arith.constant 0 : i32
    %c0_i32_1 = arith.constant 0 : i32
    return %c0_i32, %c0_i32_0 : i32, i32
  }
  func.func @transform_5(%arg0: i32) -> (i32, i32) {
    %c0_i32 = arith.constant 0 : i32
    %c0_i32_0 = arith.constant 0 : i32
    %c0_i32_1 = arith.constant 0 : i32
    return %c0_i32, %c0_i32_0 : i32, i32
  }
  func.func @transform_6(%arg0: i32) -> (i32, i32) {
    %c0_i32 = arith.constant 0 : i32
    %c0_i32_0 = arith.constant 0 : i32
    %c0_i32_1 = arith.constant 0 : i32
    return %c0_i32, %c0_i32_0 : i32, i32
  }
  func.func @transform_7(%arg0: i32) -> (i32, i32) {
    %c0_i32 = arith.constant 0 : i32
    %c0_i32_0 = arith.constant 0 : i32
    %c0_i32_1 = arith.constant 0 : i32
    return %c0_i32, %c0_i32_0 : i32, i32
  }
  func.func @transform_8(%arg0: i32) -> (i32, i32) {
    %c0_i32 = arith.constant 0 : i32
    %c0_i32_0 = arith.constant 0 : i32
    %c0_i32_1 = arith.constant 0 : i32
    return %c0_i32, %c0_i32_0 : i32, i32
  }
  func.func @transform_9(%arg0: i32) -> (i32, i32) {
    %c0_i32 = arith.constant 0 : i32
    %c0_i32_0 = arith.constant 0 : i32
    %c0_i32_1 = arith.constant 0 : i32
    return %c0_i32, %c0_i32_0 : i32, i32
  }
  func.func @transform_10(%arg0: i32) -> (i32, i32) {
    %c0_i32 = arith.constant 0 : i32
    %c0_i32_0 = arith.constant 0 : i32
    %c0_i32_1 = arith.constant 0 : i32
    return %c0_i32, %c0_i32_0 : i32, i32
  }
  func.func @transform_11(%arg0: i32) -> (i32, i32) {
    %c0_i32 = arith.constant 0 : i32
    %c0_i32_0 = arith.constant 0 : i32
    %c0_i32_1 = arith.constant 0 : i32
    return %c0_i32, %c0_i32_0 : i32, i32
  }
  func.func @transform_12(%arg0: i32) -> (i32, i32) {
    %c0_i32 = arith.constant 0 : i32
    %c0_i32_0 = arith.constant 0 : i32
    %c0_i32_1 = arith.constant 0 : i32
    return %c0_i32, %c0_i32_0 : i32, i32
  }
  func.func @transform_13(%arg0: i32) -> (i32, i32) {
    %c0_i32 = arith.constant 0 : i32
    %c0_i32_0 = arith.constant 0 : i32
    %c0_i32_1 = arith.constant 0 : i32
    return %c0_i32, %c0_i32_0 : i32, i32
  }
  func.func @transform_14(%arg0: i32) -> (i32, i32) {
    %c0_i32 = arith.constant 0 : i32
    %c0_i32_0 = arith.constant 0 : i32
    return %arg0, %c0_i32 : i32, i32
  }
  func.func @transform_15(%arg0: i32) -> (i32, i32) {
    %c0_i32 = arith.constant 0 : i32
    %c0_i32_0 = arith.constant 0 : i32
    return %arg0, %c0_i32 : i32, i32
  }
}

</mosaic_0001>

<bundles_post_ra>
// kernel: tpu_custom_call.1
= control target key start
LH: loop header
LB: loop body
LE: loop exit
PB: predicated region body
PF: predicated region fallthrough
CT: control target
= control target key end

     0   :  { %21 = vsyncpa [#allocation3], 0  ;;  %s1791_s0 = inlined_call_operand.hbm [shape: f32[16,128], index: 0, kind: input, shape index: {}]   ;;  %s1792_s1 = inlined_call_operand.hbm [shape: f32[16,128], index: 1, kind: input, shape index: {}]   ;;  %s1793_s2 = inlined_call_operand.hbm [shape: f32[128,256], index: 2, kind: input, shape index: {}]   ;;  %s1794_s3 = inlined_call_operand.vmem [shape: f32[1,256], index: 3, kind: input, shape index: {}]   ;;  %s1795_s4 = inlined_call_operand.hbm [shape: f32[256,128], index: 4, kind: input, shape index: {}]   ;;  %s1796_s5 = inlined_call_operand.vmem [shape: f32[1,128], index: 5, kind: input, shape index: {}]   ;;  %s1797_s6 = inlined_call_operand.hbm [shape: f32[128,256], index: 6, kind: input, shape index: {}]   ;;  %s1798_s7 = inlined_call_operand.vmem [shape: f32[1,256], index: 7, kind: input, shape index: {}]   ;;  %s1799_s8 = inlined_call_operand.hbm [shape: f32[128,128], index: 8, kind: input, shape index: {}]   ;;  %s1800_s9 = inlined_call_operand.vmem [shape: f32[1,128], index: 9, kind: input, shape index: {}]   ;;  %s1801_s10 = inlined_call_operand.hbm [shape: f32[128,256], index: 10, kind: input, shape index: {}]   ;;  %s1802_s11 = inlined_call_operand.vmem [shape: f32[1,256], index: 11, kind: input, shape index: {}]   ;;  %s1803_s12 = inlined_call_operand.hbm [shape: f32[256,128], index: 12, kind: input, shape index: {}]   ;;  %s1804_s13 = inlined_call_operand.vmem [shape: f32[1,128], index: 13, kind: input, shape index: {}]   ;;  %s1805_s14 = inlined_call_operand.hbm [shape: f32[16,128], index: 14, kind: output, shape index: {0}]   ;;  %s1806_s15 = inlined_call_operand.hbm [shape: f32[16,384], index: 15, kind: output, shape index: {1}]  }
   0x1   :  { %22 = vsyncpa [#allocation6], 0 }
   0x2   :  { %23 = vsyncpa [#allocation9], 0 }
   0x3   :  { %24 = vsyncpa [#allocation12], 0 }
   0x4   :  { %25 = vsyncpa [#allocation15], 0 }
   0x5   :  { %26 = vsyncpa [#allocation4], 0 }
   0x6   :  { %27 = vsyncpa [#allocation18], 0  ;;  %s1499_s18 = smov [#allocation5]   ;;  %s1500_s20 = smov [#allocation8]  }
   0x7   :  { %s45_s19 = sshll.u32 %s1499_s18, 4  ;;  %s71_s21 = sshll.u32 %s1500_s20, 4  ;;  %s46_s19 = int_to_ptr.vmem [resolvable:$true] %s45_s19  ;;  %s1596_s21 = int_to_ptr.vmem [resolvable:$true] %s71_s21 }
   0x8   :  { %s1265_s24 = scalar_lea.hbm %s1792_s1, 256 }
   0x9   :  { %p1266_p0 = scmp.ne.s32.totalorder %s1792_s1, %s1265_s24  ;;  %p1269_p1 = scmp.lt.u32.totalorder %s1265_s24, %s1792_s1 }
   0xb   :  { %p1271_p2 = pnand %p1269_p1, %p1266_p0 }
   0xd   :  { %1274 = shalt.err (!%p1271_p2)
}
   0xe   :  { %s1275_s29 = scalar_lea.vmem %s46_s19, 256  ;;  %p1280_p4 = scmp.lt.s32.totalorder %s46_s19, %s46_s19 }
   0xf   :  { %p1276_p3 = scmp.ne.s32.totalorder %s46_s19, %s1275_s29  ;;  %p1281_p5 = scmp.lt.s32.totalorder %s1275_s29, %s1275_s29 }
  0x11   :  { %p1282_p6 = por %p1281_p5, %p1280_p4 }
  0x13   :  { %p1283_p7 = pnand %p1282_p6, %p1276_p3 }
  0x15   :  { %1286 = shalt.err (!%p1283_p7)
}
  0x16   :  { %s1501_s30 = smov 128   ;;  %s1502_s16 = smov 8  }
  0x17   :  { %51 = dma.hbm_to_vmem [thread:$0]  %s1792_s1, 256, %s46_s19, [#allocation6], %s1501_s30, %s1501_s30, %s1502_s16  }
  0x18   :  { %s1287_s23 = scalar_lea.hbm %s1795_s4, 4096 }
  0x19   :  { %p1288_p8 = scmp.ne.s32.totalorder %s1795_s4, %s1287_s23  ;;  %p1291_p9 = scmp.lt.u32.totalorder %s1287_s23, %s1795_s4 }
  0x1b   :  { %p1293_p10 = pnand %p1291_p9, %p1288_p8 }
  0x1d   :  { %1296 = shalt.err (!%p1293_p10)
}
  0x1e   :  { %s1297_s28 = scalar_lea.vmem %s1596_s21, 4096  ;;  %p1302_p12 = scmp.lt.s32.totalorder %s1596_s21, %s1596_s21 }
  0x1f   :  { %p1298_p11 = scmp.ne.s32.totalorder %s1596_s21, %s1297_s28  ;;  %p1303_p13 = scmp.lt.s32.totalorder %s1297_s28, %s1297_s28 }
  0x21   :  { %p1304_p0 = por %p1303_p13, %p1302_p12 }
  0x23   :  { %p1305_p1 = pnand %p1304_p0, %p1298_p11 }
  0x25   :  { %1308 = shalt.err (!%p1305_p1)
}
  0x26   :  { %77 = dma.hbm_to_vmem [thread:$0]  %s1795_s4, 4096, %s1596_s21, [#allocation9], %s1501_s30, %s1501_s30, %s1502_s16  }
  0x27   :  { %s1503_s29 = smov [#allocation11]   ;;  %s1504_s18 = smov [#allocation2]  }
  0x28   :  { %s99_s17 = sshll.u32 %s1503_s29, 4  ;;  %s33_s20 = sshll.u32 %s1504_s18, 4  ;;  %s100_s17 = int_to_ptr.vmem [resolvable:$true] %s99_s17  ;;  %s1633_s20 = int_to_ptr.vmem [resolvable:$true] %s33_s20 }
  0x29   :  { %s1309_s24 = scalar_lea.hbm %s1799_s8, 2048 }
  0x2a   :  { %p1310_p2 = scmp.ne.s32.totalorder %s1799_s8, %s1309_s24  ;;  %p1313_p3 = scmp.lt.u32.totalorder %s1309_s24, %s1799_s8 }
  0x2c   :  { %p1315_p4 = pnand %p1313_p3, %p1310_p2 }
  0x2e   :  { %1318 = shalt.err (!%p1315_p4)
}
  0x2f   :  { %s1319_s4 = scalar_lea.vmem %s100_s17, 2048  ;;  %p1324_p6 = scmp.lt.s32.totalorder %s100_s17, %s100_s17 }
  0x30   :  { %p1320_p5 = scmp.ne.s32.totalorder %s100_s17, %s1319_s4  ;;  %p1325_p7 = scmp.lt.s32.totalorder %s1319_s4, %s1319_s4 }
  0x32   :  { %p1326_p8 = por %p1325_p7, %p1324_p6 }
  0x34   :  { %p1327_p9 = pnand %p1326_p8, %p1320_p5 }
  0x36   :  { %1330 = shalt.err (!%p1327_p9)
}
  0x37   :  { %105 = dma.hbm_to_vmem [thread:$0]  %s1799_s8, 2048, %s100_s17, [#allocation12], %s1501_s30, %s1501_s30, %s1502_s16  }
  0x38   :  { %s1331_s18 = scalar_lea.hbm %s1791_s0, 256 }
  0x39   :  { %p1332_p10 = scmp.ne.s32.totalorder %s1791_s0, %s1331_s18  ;;  %p1335_p11 = scmp.lt.u32.totalorder %s1331_s18, %s1791_s0 }
  0x3b   :  { %p1337_p12 = pnand %p1335_p11, %p1332_p10 }
  0x3d   :  { %1340 = shalt.err (!%p1337_p12)
}
  0x3e   :  { %s1341_s26 = scalar_lea.vmem %s1633_s20, 256  ;;  %p1346_p0 = scmp.lt.s32.totalorder %s1633_s20, %s1633_s20 }
  0x3f   :  { %p1342_p13 = scmp.ne.s32.totalorder %s1633_s20, %s1341_s26  ;;  %p1347_p1 = scmp.lt.s32.totalorder %s1341_s26, %s1341_s26 }
  0x41   :  { %p1348_p2 = por %p1347_p1, %p1346_p0 }
  0x43   :  { %p1349_p3 = pnand %p1348_p2, %p1342_p13 }
  0x45   :  { %1352 = shalt.err (!%p1349_p3)
}
  0x46   :  { %39 = dma.hbm_to_vmem [thread:$0]  %s1791_s0, 256, %s1633_s20, [#allocation3], %s1501_s30, %s1501_s30, %s1502_s16  }
  0x47   :  { %s1505_s27 = smov [#allocation7]   ;;  %s1353_s1 = scalar_lea.hbm %s1793_s2, 4096 }
  0x48   :  { %s57_s28 = sshll.u32 %s1505_s27, 4  ;;  %p1354_p4 = scmp.ne.s32.totalorder %s1793_s2, %s1353_s1  ;;  %s58_s28 = int_to_ptr.vmem [resolvable:$true] %s57_s28 }
  0x49   :  { %p1357_p5 = scmp.lt.u32.totalorder %s1353_s1, %s1793_s2 }
  0x4b   :  { %p1359_p6 = pnand %p1357_p5, %p1354_p4 }
  0x4d   :  { %1362 = shalt.err (!%p1359_p6)
}
  0x4e   :  { %s1363_s23 = scalar_lea.vmem %s58_s28, 4096  ;;  %p1368_p8 = scmp.lt.s32.totalorder %s58_s28, %s58_s28 }
  0x4f   :  { %p1364_p7 = scmp.ne.s32.totalorder %s58_s28, %s1363_s23  ;;  %p1369_p9 = scmp.lt.s32.totalorder %s1363_s23, %s1363_s23 }
  0x51   :  { %p1370_p10 = por %p1369_p9, %p1368_p8 }
  0x53   :  { %p1371_p11 = pnand %p1370_p10, %p1364_p7 }
  0x55   :  { %1374 = shalt.err (!%p1371_p11)
}
  0x56   :  { %s1506_s0 = smov 256   ;;  %s1507_s20 = smov 16  }
  0x57   :  { %63 = dma.hbm_to_vmem [thread:$0]  %s1793_s2, 4096, %s58_s28, [#allocation6], %s1506_s0, %s1506_s0, %s1507_s20  }
  0x58   :  { %s1508_s26 = smov [#allocation10]   ;;  %s1509_s17 = smov [#allocation13]  }
  0x59   :  { %s85_s8 = sshll.u32 %s1508_s26, 4  ;;  %s113_s27 = sshll.u32 %s1509_s17, 4  ;;  %s86_s8 = int_to_ptr.vmem [resolvable:$true] %s85_s8  ;;  %s114_s27 = int_to_ptr.vmem [resolvable:$true] %s113_s27 }
  0x5a   :  { %s1375_s1 = scalar_lea.hbm %s1797_s6, 4096 }
  0x5b   :  { %p1376_p12 = scmp.ne.s32.totalorder %s1797_s6, %s1375_s1  ;;  %p1379_p13 = scmp.lt.u32.totalorder %s1375_s1, %s1797_s6 }
  0x5d   :  { %p1381_p0 = pnand %p1379_p13, %p1376_p12 }
  0x5f   :  { %1384 = shalt.err (!%p1381_p0)
}
  0x60   :  { %s1385_s2 = scalar_lea.vmem %s86_s8, 4096  ;;  %p1390_p2 = scmp.lt.s32.totalorder %s86_s8, %s86_s8 }
  0x61   :  { %p1386_p1 = scmp.ne.s32.totalorder %s86_s8, %s1385_s2  ;;  %p1391_p3 = scmp.lt.s32.totalorder %s1385_s2, %s1385_s2 }
  0x63   :  { %p1392_p4 = por %p1391_p3, %p1390_p2 }
  0x65   :  { %p1393_p5 = pnand %p1392_p4, %p1386_p1 }
  0x67   :  { %1396 = shalt.err (!%p1393_p5)
}
  0x68   :  { %91 = dma.hbm_to_vmem [thread:$0]  %s1797_s6, 4096, %s86_s8, [#allocation9], %s1506_s0, %s1506_s0, %s1507_s20  }
  0x69   :  { %s1397_s26 = scalar_lea.hbm %s1801_s10, 4096 }
  0x6a   :  { %p1398_p6 = scmp.ne.s32.totalorder %s1801_s10, %s1397_s26  ;;  %p1401_p7 = scmp.lt.u32.totalorder %s1397_s26, %s1801_s10 }
  0x6c   :  { %p1403_p8 = pnand %p1401_p7, %p1398_p6 }
  0x6e   :  { %1406 = shalt.err (!%p1403_p8)
}
  0x6f   :  { %s1407_s19 = scalar_lea.vmem %s114_s27, 4096  ;;  %p1412_p10 = scmp.lt.s32.totalorder %s114_s27, %s114_s27 }
  0x70   :  { %p1408_p9 = scmp.ne.s32.totalorder %s114_s27, %s1407_s19  ;;  %p1413_p11 = scmp.lt.s32.totalorder %s1407_s19, %s1407_s19 }
  0x72   :  { %p1414_p12 = por %p1413_p11, %p1412_p10 }
  0x74   :  { %p1415_p13 = pnand %p1414_p12, %p1408_p9 }
  0x76   :  { %1418 = shalt.err (!%p1415_p13)
}
  0x77   :  { %119 = dma.hbm_to_vmem [thread:$0]  %s1801_s10, 4096, %s114_s27, [#allocation12], %s1506_s0, %s1506_s0, %s1507_s20  }
  0x78   :  { %s1510_s29 = smov [#allocation14]   ;;  %s1419_s28 = scalar_lea.hbm %s1803_s12, 4096 }
  0x79   :  { %s127_s18 = sshll.u32 %s1510_s29, 4  ;;  %p1420_p0 = scmp.ne.s32.totalorder %s1803_s12, %s1419_s28  ;;  %s128_s18 = int_to_ptr.vmem [resolvable:$true] %s127_s18 }
  0x7a   :  { %p1423_p1 = scmp.lt.u32.totalorder %s1419_s28, %s1803_s12 }
  0x7c   :  { %p1425_p2 = pnand %p1423_p1, %p1420_p0 }
  0x7e   :  { %1428 = shalt.err (!%p1425_p2)
}
  0x7f   :  { %s1429_s17 = scalar_lea.vmem %s128_s18, 4096  ;;  %p1434_p4 = scmp.lt.s32.totalorder %s128_s18, %s128_s18 }
  0x80   :  { %p1430_p3 = scmp.ne.s32.totalorder %s128_s18, %s1429_s17  ;;  %p1435_p5 = scmp.lt.s32.totalorder %s1429_s17, %s1429_s17 }
  0x82   :  { %p1436_p6 = por %p1435_p5, %p1434_p4 }
  0x84   :  { %p1437_p7 = pnand %p1436_p6, %p1430_p3 }
  0x86   :  { %1440 = shalt.err (!%p1437_p7)
}
  0x87   :  { %133 = dma.hbm_to_vmem [thread:$0]  %s1803_s12, 4096, %s128_s18, [#allocation15], %s1501_s30, %s1501_s30, %s1502_s16  }
  0x88   :  { %1485 = dma.done.wait [#allocation3], 256  }
  0x89   :  { %1486 = vsyncadd [#allocation3], 4294967040 }
  0x8a   :  { %1487 = dma.done.wait [#allocation6], 4352  }
  0x8b   :  { %1488 = vsyncadd [#allocation6], 4294962944 }
  0x8c   :  { %1489 = dma.done.wait [#allocation9], 8192  }
  0x8d   :  { %1490 = vsyncadd [#allocation9], 4294959104 }
  0x8e   :  { %1491 = dma.done.wait [#allocation12], 6144  }
  0x8f   :  { %1492 = vsyncadd [#allocation12], 4294961152 }
  0x90   :  { %1493 = dma.done.wait [#allocation15], 4096  }
  0x91   :  { %1494 = vsyncadd [#allocation15], 4294963200  ;;  %v1511_v0 = vmov 0.0   ;;  %v163_v1 = vld [vmem:[#allocation7 + $0x8] sm:$0xff]  ;;  %v165_v2 = vld [vmem:[#allocation7 + $0x18] sm:$0xff] }
  0x92   :  { %270 = vmatprep.mubr.f32.mxu0 %v1511_v0  ;;  %v162_v3 = vld [vmem:[#allocation7] sm:$0xff]  ;;  %v1052_v4 = vpack.c.bf16 %v165_v2, %v163_v1  ;;  %v164_v5 = vld [vmem:[#allocation7 + $0x10] sm:$0xff]  ;;  %v167_v6 = vld [vmem:[#allocation7 + $0x28] sm:$0xff] }
  0x93   :  { %v169_v7 = vld [vmem:[#allocation7 + $0x38] sm:$0xff]  ;;  %v1054_v8 = vpack.c.bf16 %v164_v5, %v162_v3  ;;  %v166_v10 = vld [vmem:[#allocation7 + $0x20] sm:$0xff]  ;;  %v168_v11 = vld [vmem:[#allocation7 + $0x30] sm:$0xff] }
  0x94   :  { %v1056_v9 = vpack.c.bf16 %v169_v7, %v167_v6  ;;  %v171_v12 = vld [vmem:[#allocation7 + $0x48] sm:$0xff]  ;;  %1053 = vmatprep.subr.bf16.mxu0 %v1052_v4  ;;  %v173_v13 = vld [vmem:[#allocation7 + $0x58] sm:$0xff]  ;;  %v1058_v14 = vpack.c.bf16 %v168_v11, %v166_v10  ;;  %v170_v16 = vld [vmem:[#allocation7 + $0x40] sm:$0xff] }
  0x95   :  { %1055 = vmatpush1.bf16.msra.mxu0 %v1054_v8  ;;  %v1060_v15 = vpack.c.bf16 %v173_v13, %v171_v12  ;;  %v172_v17 = vld [vmem:[#allocation7 + $0x50] sm:$0xff]  ;;  %v175_v18 = vld [vmem:[#allocation7 + $0x68] sm:$0xff]  ;;  %v177_v19 = vld [vmem:[#allocation7 + $0x78] sm:$0xff] }
  0x96   :  { %1057 = vmatprep.subr.bf16.mxu0 %v1056_v9  ;;  %v1062_v20 = vpack.c.bf16 %v172_v17, %v170_v16  ;;  %v1064_v21 = vpack.c.bf16 %v177_v19, %v175_v18  ;;  %v174_v22 = vld [vmem:[#allocation7 + $0x60] sm:$0xff]  ;;  %v176_v23 = vld [vmem:[#allocation7 + $0x70] sm:$0xff]  ;;  %v179_v24 = vld [vmem:[#allocation7 + $0x88] sm:$0xff] }
  0x97   :  { %v181_v25 = vld [vmem:[#allocation7 + $0x98] sm:$0xff]  ;;  %v178_v26 = vld [vmem:[#allocation7 + $0x80] sm:$0xff]  ;;  %v180_v27 = vld [vmem:[#allocation7 + $0x90] sm:$0xff]  ;;  %v1066_v30 = vpack.c.bf16 %v176_v23, %v174_v22 }
  0x98   :  { %v303_v28 = vld [vmem:[#allocation8 + $0x80] sm:$0xff]  ;;  %v304_v29 = vld [vmem:[#allocation8 + $0x88] sm:$0xff]  ;;  %v305_v35 = vld [vmem:[#allocation8 + $0x90] sm:$0xff]  ;;  %v1068_v36 = vpack.c.bf16 %v181_v25, %v179_v24  ;;  %v1070_v46 = vpack.c.bf16 %v180_v27, %v178_v26 }
  0x99   :  { %1059 = vmatpush1.bf16.msra.mxu0 %v1058_v14  ;;  %v183_v31 = vld [vmem:[#allocation7 + $0xa8] sm:$0xff]  ;;  %v1084_v32 = vpack.c.bf16 %v304_v29, %v303_v28  ;;  %v287_v33 = vld [vmem:[#allocation8] sm:$0xff]  ;;  %v306_v38 = vld [vmem:[#allocation8 + $0x98] sm:$0xff] }
  0x9a   :  { %1061 = vmatprep.subr.bf16.mxu0 %v1060_v15  ;;  %v288_v34 = vld [vmem:[#allocation8 + $0x8] sm:$0xff]  ;;  %v289_v39 = vld [vmem:[#allocation8 + $0x10] sm:$0xff]  ;;  %v290_v40 = vld [vmem:[#allocation8 + $0x18] sm:$0xff]  ;;  %v1088_v42 = vpack.c.bf16 %v306_v38, %v305_v35 }
  0x9b   :  { %v1086_v37 = vpack.c.bf16 %v288_v34, %v287_v33  ;;  %v185_v41 = vld [vmem:[#allocation7 + $0xb8] sm:$0xff]  ;;  %1085 = vmatprep.subr.bf16.mxu1 %v1084_v32  ;;  %v307_v43 = vld [vmem:[#allocation8 + $0xa0] sm:$0xff]  ;;  %v308_v44 = vld [vmem:[#allocation8 + $0xa8] sm:$0xff]  ;;  %v1090_v45 = vpack.c.bf16 %v290_v40, %v289_v39 }
  0x9c   :  { %v182_v47 = vld [vmem:[#allocation7 + $0xa0] sm:$0xff]  ;;  %v1092_v48 = vpack.c.bf16 %v308_v44, %v307_v43  ;;  %v292_v50 = vld [vmem:[#allocation8 + $0x28] sm:$0xff]  ;;  %v1072_v51 = vpack.c.bf16 %v185_v41, %v183_v31  ;;  %v184_v52 = vld [vmem:[#allocation7 + $0xb0] sm:$0xff] }
  0x9d   :  { %1063 = vmatpush1.bf16.msra.mxu0 %v1062_v20  ;;  %1087 = vmatpush3.bf16.msra.mxu1 %v1086_v37  ;;  %v291_v49 = vld [vmem:[#allocation8 + $0x20] sm:$0xff]  ;;  %v309_v53 = vld [vmem:[#allocation8 + $0xb0] sm:$0xff]  ;;  %v310_v54 = vld [vmem:[#allocation8 + $0xb8] sm:$0xff]  ;;  %v1074_v58 = vpack.c.bf16 %v184_v52, %v182_v47 }
  0x9e   :  { %1065 = vmatprep.subr.bf16.mxu0 %v1064_v21  ;;  %1089 = vmatprep.subr.bf16.mxu1 %v1088_v42  ;;  %v187_v55 = vld [vmem:[#allocation7 + $0xc8] sm:$0xff]  ;;  %v189_v56 = vld [vmem:[#allocation7 + $0xd8] sm:$0xff]  ;;  %v1094_v57 = vpack.c.bf16 %v292_v50, %v291_v49  ;;  %v186_v59 = vld [vmem:[#allocation7 + $0xc0] sm:$0xff]  ;;  %v1096_v60 = vpack.c.bf16 %v310_v54, %v309_v53 }
  0x9f   :  { %v293_v61 = vld [vmem:[#allocation8 + $0x30] sm:$0xff]  ;;  %v294_v62 = vld [vmem:[#allocation8 + $0x38] sm:$0xff]  ;;  %v1076_v63 = vpack.c.bf16 %v189_v56, %v187_v55  ;;  %v311_v2 = vld [vmem:[#allocation8 + $0xc0] sm:$0xff] }
  0xa0   :  { %v188_v1 = vld [vmem:[#allocation7 + $0xd0] sm:$0xff]  ;;  %v312_v3 = vld [vmem:[#allocation8 + $0xc8] sm:$0xff]  ;;  %v193_v5 = vld [vmem:[#allocation7 + $0xf8] sm:$0xff]  ;;  %v1098_v6 = vpack.c.bf16 %v294_v62, %v293_v61 }
  0xa1   :  { %1067 = vmatpush1.bf16.msra.mxu0 %v1066_v30  ;;  %1091 = vmatpush3.bf16.msra.mxu1 %v1090_v45  ;;  %v191_v4 = vld [vmem:[#allocation7 + $0xe8] sm:$0xff]  ;;  %v1078_v7 = vpack.c.bf16 %v188_v1, %v186_v59  ;;  %v190_v8 = vld [vmem:[#allocation7 + $0xe0] sm:$0xff]  ;;  %v1100_v9 = vpack.c.bf16 %v312_v3, %v311_v2  ;;  %v192_v13 = vld [vmem:[#allocation7 + $0xf0] sm:$0xff] }
  0xa2   :  { %1069 = vmatprep.subr.bf16.mxu0 %v1068_v36  ;;  %1093 = vmatprep.subr.bf16.mxu1 %v1092_v48  ;;  %v295_v10 = vld [vmem:[#allocation8 + $0x40] sm:$0xff]  ;;  %v296_v11 = vld [vmem:[#allocation8 + $0x48] sm:$0xff]  ;;  %v1080_v12 = vpack.c.bf16 %v193_v5, %v191_v4  ;;  %v313_v14 = vld [vmem:[#allocation8 + $0xd0] sm:$0xff]  ;;  %v1082_v17 = vpack.c.bf16 %v192_v13, %v190_v8 }
  0xa3   :  { %v314_v15 = vld [vmem:[#allocation8 + $0xd8] sm:$0xff]  ;;  %v1102_v16 = vpack.c.bf16 %v296_v11, %v295_v10  ;;  %v297_v19 = vld [vmem:[#allocation8 + $0x50] sm:$0xff]  ;;  %v315_v21 = vld [vmem:[#allocation8 + $0xe0] sm:$0xff] }
  0xa4   :  { %v1104_v18 = vpack.c.bf16 %v314_v15, %v313_v14  ;;  %v298_v20 = vld [vmem:[#allocation8 + $0x58] sm:$0xff]  ;;  %v316_v22 = vld [vmem:[#allocation8 + $0xe8] sm:$0xff]  ;;  %v160_v24 = vld [vmem:[#allocation2] sm:$0xff] }
  0xa5   :  { %1071 = vmatpush1.bf16.msra.mxu0 %v1070_v46  ;;  %1095 = vmatpush3.bf16.msra.mxu1 %v1094_v57  ;;  %v1106_v23 = vpack.c.bf16 %v298_v20, %v297_v19  ;;  %v1108_v25 = vpack.c.bf16 %v316_v22, %v315_v21  ;;  %v161_v26 = vld [vmem:[#allocation2 + $0x8] sm:$0xff]  ;;  %v299_v27 = vld [vmem:[#allocation8 + $0x60] sm:$0xff]  ;;  %v317_v30 = vld [vmem:[#allocation8 + $0xf0] sm:$0xff] }
  0xa6   :  { %1073 = vmatprep.subr.bf16.mxu0 %v1072_v51  ;;  %1097 = vmatprep.subr.bf16.mxu1 %v1096_v60  ;;  %v300_v28 = vld [vmem:[#allocation8 + $0x68] sm:$0xff]  ;;  %v318_v31 = vld [vmem:[#allocation8 + $0xf8] sm:$0xff]  ;;  %v301_v33 = vld [vmem:[#allocation8 + $0x70] sm:$0xff] }
  0xa7   :  { %v1110_v29 = vpack.c.bf16 %v300_v28, %v299_v27  ;;  %v1112_v32 = vpack.c.bf16 %v318_v31, %v317_v30  ;;  %v302_v34 = vld [vmem:[#allocation8 + $0x78] sm:$0xff]  ;;  %v404_v36 = vld [vmem:[#allocation10 + $0x8] sm:$0xff]  ;;  %v403_v38 = vld [vmem:[#allocation10] sm:$0xff] }
  0xa8   :  { %v1114_v35 = vpack.c.bf16 %v302_v34, %v301_v33  ;;  %v406_v37 = vld [vmem:[#allocation10 + $0x18] sm:$0xff]  ;;  %v405_v40 = vld [vmem:[#allocation10 + $0x10] sm:$0xff]  ;;  %v408_v41 = vld [vmem:[#allocation10 + $0x28] sm:$0xff] }
  0xa9   :  { %1075 = vmatpush1.bf16.msra.mxu0 %v1074_v58  ;;  %1099 = vmatpush3.bf16.msra.mxu1 %v1098_v6  ;;  %v1116_v39 = vpack.c.bf16 %v406_v37, %v404_v36  ;;  %v410_v42 = vld [vmem:[#allocation10 + $0x38] sm:$0xff]  ;;  %v1118_v43 = vpack.c.bf16 %v405_v40, %v403_v38  ;;  %v407_v45 = vld [vmem:[#allocation10 + $0x20] sm:$0xff]  ;;  %v409_v46 = vld [vmem:[#allocation10 + $0x30] sm:$0xff] }
  0xaa   :  { %1077 = vmatprep.subr.bf16.mxu0 %v1076_v63  ;;  %1101 = vmatprep.subr.bf16.mxu1 %v1100_v9  ;;  %v1120_v44 = vpack.c.bf16 %v410_v42, %v408_v41  ;;  %v412_v47 = vld [vmem:[#allocation10 + $0x48] sm:$0xff]  ;;  %v414_v48 = vld [vmem:[#allocation10 + $0x58] sm:$0xff]  ;;  %v1122_v49 = vpack.c.bf16 %v409_v46, %v407_v45  ;;  %v411_v51 = vld [vmem:[#allocation10 + $0x40] sm:$0xff]  ;;  %v196_v9 = vlaneseq }
  0xab   :  { %v1124_v50 = vpack.c.bf16 %v414_v48, %v412_v47  ;;  %v413_v52 = vld [vmem:[#allocation10 + $0x50] sm:$0xff]  ;;  %v416_v53 = vld [vmem:[#allocation10 + $0x68] sm:$0xff]  ;;  %v418_v54 = vld [vmem:[#allocation10 + $0x78] sm:$0xff] }
  0xac   :  { %v1126_v55 = vpack.c.bf16 %v413_v52, %v411_v51  ;;  %v1128_v56 = vpack.c.bf16 %v418_v54, %v416_v53  ;;  %v415_v57 = vld [vmem:[#allocation10 + $0x60] sm:$0xff]  ;;  %v417_v58 = vld [vmem:[#allocation10 + $0x70] sm:$0xff]  ;;  %v420_v59 = vld [vmem:[#allocation10 + $0x88] sm:$0xff]  ;;  %v197_v10 = vshrl.u32 %v196_v9, 7 }
  0xad   :  { %1079 = vmatpush1.bf16.msra.mxu0 %v1078_v7  ;;  %1103 = vmatpush3.bf16.msra.mxu1 %v1102_v16  ;;  %v422_v60 = vld [vmem:[#allocation10 + $0x98] sm:$0xff]  ;;  %v1130_v61 = vpack.c.bf16 %v417_v58, %v415_v57  ;;  %v419_v63 = vld [vmem:[#allocation10 + $0x80] sm:$0xff]  ;;  %v421_v1 = vld [vmem:[#allocation10 + $0x90] sm:$0xff] }
  0xae   :  { %1081 = vmatprep.subr.bf16.mxu0 %v1080_v12  ;;  %1105 = vmatprep.subr.bf16.mxu1 %v1104_v18  ;;  %v1132_v62 = vpack.c.bf16 %v422_v60, %v420_v59  ;;  %v424_v2 = vld [vmem:[#allocation10 + $0xa8] sm:$0xff]  ;;  %v426_v3 = vld [vmem:[#allocation10 + $0xb8] sm:$0xff]  ;;  %v1134_v4 = vpack.c.bf16 %v421_v1, %v419_v63  ;;  %v423_v6 = vld [vmem:[#allocation10 + $0xa0] sm:$0xff]  ;;  %v1733_v11 = vsub.s32 0, %v197_v10  ;;  %v1738_v13 = vsub.s32 1, %v197_v10 }
  0xaf   :  { %v1136_v5 = vpack.c.bf16 %v426_v3, %v424_v2  ;;  %v425_v7 = vld [vmem:[#allocation10 + $0xb0] sm:$0xff]  ;;  %v194_v12 = vld [vmem:[%s1794_s3] sm:$0x3]  ;;  %v428_v28 = vld [vmem:[#allocation10 + $0xc8] sm:$0xff] }
  0xb0   :  { %v1138_v8 = vpack.c.bf16 %v425_v7, %v423_v6  ;;  %v199_v14 = vrot.slane %v194_v12, %v1733_v11  ;;  %v203_v15 = vrot.slane %v194_v12, %v1738_v13  ;;  %v427_v31 = vld [vmem:[#allocation10 + $0xc0] sm:$0xff]  ;;  %v432_v34 = vld [vmem:[#allocation10 + $0xe8] sm:$0xff]  ;;  %v433_v38 = vld [vmem:[#allocation10 + $0xf0] sm:$0xff] }
  0xb1   :  { %1083 = vmatpush1.bf16.msra.mxu0 %v1082_v17  ;;  %1107 = vmatpush3.bf16.msra.mxu1 %v1106_v23  ;;  %v431_v37 = vld [vmem:[#allocation10 + $0xe0] sm:$0xff]  ;;  %v537_v41 = vld [vmem:[#allocation11 + $0x8] sm:$0xff]  ;;  %v538_v42 = vld [vmem:[#allocation11 + $0x10] sm:$0xff] }
  0xb2   :  { %1109 = vmatprep.subr.bf16.mxu1 %v1108_v25  ;;  %1117 = vmatprep.subr.bf16.mxu0 %v1116_v39  ;;  %v1146_v39 = vpack.c.bf16 %v433_v38, %v431_v37  ;;  %v536_v40 = vld [vmem:[#allocation11] sm:$0xff]  ;;  %v541_v58 = vld [vmem:[#allocation11 + $0x28] sm:$0xff]  ;;  %v542_v60 = vld [vmem:[#allocation11 + $0x30] sm:$0xff] }
  0xb3   :  { %v920_v47 = vld [vmem:[%s1796_s5] ss:$0 sm:$0xff]  ;;  %v545_v1 = vld [vmem:[#allocation11 + $0x48] sm:$0xff]  ;;  %v546_v3 = vld [vmem:[#allocation11 + $0x50] sm:$0xff] }
  0xb4   :  { %271 = vmatmul.mubr.f32.vlgmr.msra.gmra.mrb[0].mxu0 %v160_v24  ;;  %v540_v57 = vld [vmem:[#allocation11 + $0x20] sm:$0xff]  ;;  %v549_v7 = vld [vmem:[#allocation11 + $0x68] sm:$0xff]  ;;  %v550_v9 = vld [vmem:[#allocation11 + $0x70] sm:$0xff] }
  0xb5   :  { %276 = vmatprep.mubr.f32.mxu0 %v1511_v0  ;;  %1111 = vmatpush3.bf16.msra.mxu1 %v1110_v29  ;;  %v430_v29 = vld [vmem:[#allocation10 + $0xd8] sm:$0xff]  ;;  %v1156_v59 = vpack.c.bf16 %v541_v58, %v540_v57  ;;  %v544_v63 = vld [vmem:[#allocation11 + $0x40] sm:$0xff]  ;;  %v653_v37 = vld [vmem:[#allocation13 + $0x88] sm:$0xff] }
  0xb6   :  { %1113 = vmatprep.subr.bf16.mxu1 %v1112_v32  ;;  %1119 = vmatpush1.bf16.msra.mxu0 %v1118_v43  ;;  %v1140_v30 = vpack.c.bf16 %v430_v29, %v428_v28  ;;  %v429_v32 = vld [vmem:[#allocation10 + $0xd0] sm:$0xff]  ;;  %v1148_v43 = vpack.c.bf16 %v537_v41, %v536_v40  ;;  %v1164_v2 = vpack.c.bf16 %v545_v1, %v544_v63  ;;  %v551_v10 = vld [vmem:[#allocation11 + $0x78] sm:$0xff]  ;;  %v644_v29 = vld [vmem:[#allocation13 + $0x40] sm:$0xff] }
  0xb7   :  { %1121 = vmatprep.subr.bf16.mxu0 %v1120_v44  ;;  %v1142_v33 = vpack.c.bf16 %v429_v32, %v427_v31  ;;  %v539_v44 = vld [vmem:[#allocation11 + $0x18] sm:$0xff]  ;;  %v1176_v12 = vpack.c.bf16 %v551_v10, %v550_v9  ;;  %v649_v31 = vld [vmem:[#allocation13 + $0x68] sm:$0xff]  ;;  %v652_v41 = vld [vmem:[#allocation13 + $0x80] sm:$0xff] }
  0xb8   :  { %277 = vmatmul.mubr.f32.gmra.mrb[2].mxu0 %v161_v26  ;;  %v1152_v45 = vpack.c.bf16 %v539_v44, %v538_v42  ;;  %v651_v32 = vld [vmem:[#allocation13 + $0x78] sm:$0xff]  ;;  %v654_v42 = vld [vmem:[#allocation13 + $0x90] sm:$0xff] }
  0xb9   :  { %511 = vmatprep.mubr.f32.mxu0 %v1511_v0  ;;  %1115 = vmatpush3.bf16.msra.mxu1 %v1114_v35  ;;  %v434_v35 = vld [vmem:[#allocation10 + $0xf8] sm:$0xff] }
  0xba   :  { %1123 = vmatpush1.bf16.msra.mxu0 %v1122_v49  ;;  %v1144_v36 = vpack.c.bf16 %v434_v35, %v432_v34  ;;  %1149 = vmatprep.subr.bf16.mxu1 %v1148_v43  ;;  %v1192_v34 = vpack.c.bf16 %v651_v32, %v649_v31  ;;  %v648_v35 = vld [vmem:[#allocation13 + $0x60] sm:$0xff]  ;;  %v655_v38 = vld [vmem:[#allocation13 + $0x98] sm:$0xff] }
  0xbb   :  { %1125 = vmatprep.subr.bf16.mxu0 %v1124_v50  ;;  %v1196_v40 = vpack.c.bf16 %v655_v38, %v653_v37  ;;  %v659_v44 = vld [vmem:[#allocation13 + $0xb8] sm:$0xff] }
  0xbe   :  { %1127 = vmatpush1.bf16.msra.mxu0 %v1126_v55 }
  0xbf   :  { %1129 = vmatprep.subr.bf16.mxu0 %v1128_v56 }
  0xc2   :  { %1131 = vmatpush1.bf16.msra.mxu0 %v1130_v61  ;;  %v543_v61 = vld [vmem:[#allocation11 + $0x38] sm:$0xff] }
  0xc3   :  { %1133 = vmatprep.subr.bf16.mxu0 %v1132_v62  ;;  %v1160_v62 = vpack.c.bf16 %v543_v61, %v542_v60 }
  0xc6   :  { %1135 = vmatpush1.bf16.msra.mxu0 %v1134_v4  ;;  %v547_v4 = vld [vmem:[#allocation11 + $0x58] sm:$0xff] }
  0xc7   :  { %1137 = vmatprep.subr.bf16.mxu0 %v1136_v5  ;;  %v548_v5 = vld [vmem:[#allocation11 + $0x60] sm:$0xff]  ;;  %v1168_v6 = vpack.c.bf16 %v547_v4, %v546_v3 }
  0xca   :  { %1139 = vmatpush1.bf16.msra.mxu0 %v1138_v8  ;;  %v1172_v8 = vpack.c.bf16 %v549_v7, %v548_v5 }
  0xcb   :  { %1141 = vmatprep.subr.bf16.mxu0 %v1140_v30  ;;  %v646_v30 = vld [vmem:[#allocation13 + $0x50] sm:$0xff] }
  0xce   :  { %1143 = vmatpush1.bf16.msra.mxu0 %v1142_v33  ;;  %v1190_v33 = vpack.c.bf16 %v646_v30, %v644_v29  ;;  %v779_v29 = vld [vmem:[#allocation14 + $0x90] sm:$0xff]  ;;  %v780_v30 = vld [vmem:[#allocation14 + $0x98] sm:$0xff] }
  0xcf   :  { %1145 = vmatprep.subr.bf16.mxu0 %v1144_v36  ;;  %v650_v36 = vld [vmem:[#allocation13 + $0x70] sm:$0xff]  ;;  %v1216_v32 = vpack.c.bf16 %v780_v30, %v779_v29 }
  0xd2   :  { %1147 = vmatpush1.bf16.msra.mxu0 %v1146_v39  ;;  %v1194_v39 = vpack.c.bf16 %v650_v36, %v648_v35  ;;  %v781_v35 = vld [vmem:[#allocation14 + $0xa0] sm:$0xff]  ;;  %v782_v36 = vld [vmem:[#allocation14 + $0xa8] sm:$0xff] }
  0xd3   :  { %v1220_v38 = vpack.c.bf16 %v782_v36, %v781_v35 }
 0x187   :  { %v272_v16 = vpop.f32.mrb[0].mxu0 }
 0x188   :  { %v273_v17 = vadd.f32 %v272_v16, %v199_v14  ;;  %v274_v18 = vpop.f32.mrb[1].mxu0  ;;  %v636_v16 = vld [vmem:[#allocation13] sm:$0xff] }
 0x189   :  { %v275_v19 = vadd.f32 %v274_v18, %v203_v15  ;;  %v638_v18 = vld [vmem:[#allocation13 + $0x10] sm:$0xff] }
 0x18a   :  { %v283_v22 = vmax.f32 %v273_v17, 0.0 }
 0x18b   :  { %v278_v20 = vpop.f32.mrb[2].mxu0  ;;  %v284_v21 = vmax.f32 %v275_v19, 0.0  ;;  %v641_v19 = vld [vmem:[#allocation13 + $0x28] sm:$0xff] }
 0x18c   :  { %v279_v23 = vadd.f32 %v278_v20, %v199_v14  ;;  %v280_v24 = vpop.f32.mrb[3].mxu0  ;;  %v637_v14 = vld [vmem:[#allocation13 + $0x8] sm:$0xff]  ;;  %v643_v20 = vld [vmem:[#allocation13 + $0x38] sm:$0xff] }
 0x18d   :  { %v281_v25 = vadd.f32 %v280_v24, %v203_v15  ;;  %390 = vmatprep.mubr.f32.mxu1 %v284_v21  ;;  %v639_v15 = vld [vmem:[#allocation13 + $0x18] sm:$0xff]  ;;  %v1182_v21 = vpack.c.bf16 %v638_v18, %v636_v16  ;;  %v642_v24 = vld [vmem:[#allocation13 + $0x30] sm:$0xff]  ;;  %v665_v18 = vld [vmem:[#allocation13 + $0xe8] sm:$0xff] }
 0x18e   :  { %391 = vmatmul.mubr.f32.vlgmr.msra.gmra.mrb[0].mxu1 %v283_v22  ;;  %v285_v27 = vmax.f32 %v279_v23, 0.0  ;;  %v1180_v17 = vpack.c.bf16 %v639_v15, %v637_v14  ;;  %v1184_v22 = vpack.c.bf16 %v643_v20, %v641_v19  ;;  %v640_v23 = vld [vmem:[#allocation13 + $0x20] sm:$0xff]  ;;  %v667_v19 = vld [vmem:[#allocation13 + $0xf8] sm:$0xff] }
 0x18f   :  { %v286_v26 = vmax.f32 %v281_v25, 0.0  ;;  %1151 = vmatpush3.bf16.msra.mxu1 %v1148_v43  ;;  %v645_v25 = vld [vmem:[#allocation13 + $0x48] sm:$0xff]  ;;  %v1208_v20 = vpack.c.bf16 %v667_v19, %v665_v18  ;;  %v668_v18 = vld [vmem:[%s1802_s11] sm:$0x3]  ;;  %s1512_s11 = smov [#allocation17]  }
 0x190   :  { %1153 = vmatprep.subr.bf16.mxu1 %v1152_v45  ;;  %1181 = vmatprep.subr.bf16.mxu0 %v1180_v17  ;;  %v657_v43 = vld [vmem:[#allocation13 + $0xa8] sm:$0xff]  ;;  %v677_v19 = vrot.slane %v668_v18, %v1738_v13  ;;  %s900_s19 = sshll.u32 %s1512_s11, 4  ;;  %s901_s19 = int_to_ptr.vmem [resolvable:$true] %s900_s19 }
 0x191   :  { %395 = vmatprep.mubr.f32.mxu1 %v286_v26  ;;  %v647_v26 = vld [vmem:[#allocation13 + $0x58] sm:$0xff]  ;;  %s1441_s6 = scalar_lea.vmem %s901_s19, 768  ;;  %p1446_p9 = scmp.lt.s32.totalorder %s901_s19, %s901_s19 }
 0x192   :  { %396 = vmatmul.mubr.f32.gmra.mrb[2].mxu1 %v285_v27  ;;  %v1186_v27 = vpack.c.bf16 %v642_v24, %v640_v23  ;;  %v1188_v28 = vpack.c.bf16 %v647_v26, %v645_v25  ;;  %v777_v24 = vld [vmem:[#allocation14 + $0x80] sm:$0xff]  ;;  %v778_v25 = vld [vmem:[#allocation14 + $0x88] sm:$0xff]  ;;  %p1442_p8 = scmp.ne.s32.totalorder %s901_s19, %s1441_s6  ;;  %p1447_p10 = scmp.lt.s32.totalorder %s1441_s6, %s1441_s6 }
 0x193   :  { %1155 = vmatpush3.bf16.msra.mxu1 %v1152_v45  ;;  %v1198_v45 = vpack.c.bf16 %v654_v42, %v652_v41  ;;  %v761_v26 = vld [vmem:[#allocation14] sm:$0xff]  ;;  %v783_v41 = vld [vmem:[#allocation14 + $0xb0] sm:$0xff]  ;;  %v784_v42 = vld [vmem:[#allocation14 + $0xb8] sm:$0xff] }
 0x194   :  { %1157 = vmatprep.subr.bf16.mxu1 %v1156_v59  ;;  %p1448_p11 = por %p1447_p10, %p1446_p9 }
 0x196   :  { %p1449_p12 = pnand %p1448_p11, %p1442_p8 }
 0x197   :  { %1159 = vmatpush3.bf16.msra.mxu1 %v1156_v59 }
 0x198   :  { %1161 = vmatprep.subr.bf16.mxu1 %v1160_v62 }
 0x19b   :  { %1163 = vmatpush3.bf16.msra.mxu1 %v1160_v62 }
 0x19c   :  { %1165 = vmatprep.subr.bf16.mxu1 %v1164_v2 }
 0x19f   :  { %1167 = vmatpush3.bf16.msra.mxu1 %v1164_v2 }
 0x1a0   :  { %1169 = vmatprep.subr.bf16.mxu1 %v1168_v6 }
 0x1a3   :  { %1171 = vmatpush3.bf16.msra.mxu1 %v1168_v6 }
 0x1a4   :  { %1173 = vmatprep.subr.bf16.mxu1 %v1172_v8 }
 0x1a7   :  { %1175 = vmatpush3.bf16.msra.mxu1 %v1172_v8  ;;  %v530_v8 = vld [vmem:[#allocation5] sm:$0xff] }
 0x1a8   :  { %1177 = vmatprep.subr.bf16.mxu1 %v1176_v12 }
 0x1ab   :  { %1179 = vmatpush3.bf16.msra.mxu1 %v1176_v12  ;;  %v531_v12 = vld [vmem:[#allocation5 + $0x8] sm:$0xff] }
 0x261   :  { %v955_v46 = vpop.f32.mrb[0].mxu1 }
 0x262   :  { %v956_v48 = vpop.f32.mrb[1].mxu1 }
 0x263   :  { %v957_v49 = vadd.f32 %v956_v48, %v955_v46  ;;  %v1200_v46 = vpack.c.bf16 %v659_v44, %v657_v43  ;;  %v658_v48 = vld [vmem:[#allocation13 + $0xb0] sm:$0xff]  ;;  %v1224_v44 = vpack.c.bf16 %v784_v42, %v783_v41 }
 0x265   :  { %v393_v50 = vadd.f32 %v957_v49, %v920_v47  ;;  %v958_v51 = vpop.f32.mrb[2].mxu1  ;;  %v661_v49 = vld [vmem:[#allocation13 + $0xc8] sm:$0xff] }
 0x266   :  { %v959_v52 = vpop.f32.mrb[3].mxu1 }
 0x267   :  { %v401_v53 = vmax.f32 %v393_v50, 0.0  ;;  %v960_v54 = vadd.f32 %v959_v52, %v958_v51  ;;  %v663_v50 = vld [vmem:[#allocation13 + $0xd8] sm:$0xff] }
 0x268   :  { %v1204_v52 = vpack.c.bf16 %v663_v50, %v661_v49 }
 0x269   :  { %v398_v55 = vadd.f32 %v960_v54, %v920_v47  ;;  %512 = vmatmul.mubr.f32.vlgmr.msra.gmra.mrb[4].mxu0 %v401_v53  ;;  %v656_v47 = vld [vmem:[#allocation13 + $0xa0] sm:$0xff]  ;;  %v662_v54 = vld [vmem:[#allocation13 + $0xd0] sm:$0xff] }
 0x26a   :  { %517 = vmatprep.mubr.f32.mxu0 %v1511_v0  ;;  %1183 = vmatpush1.bf16.msra.mxu0 %v1182_v21  ;;  %v1202_v51 = vpack.c.bf16 %v658_v48, %v656_v47  ;;  %v660_v53 = vld [vmem:[#allocation13 + $0xc0] sm:$0xff]  ;;  %v786_v48 = vld [vmem:[#allocation14 + $0xc8] sm:$0xff] }
 0x26b   :  { %v402_v56 = vmax.f32 %v398_v55, 0.0  ;;  %1185 = vmatprep.subr.bf16.mxu0 %v1184_v22  ;;  %v1206_v55 = vpack.c.bf16 %v662_v54, %v660_v53  ;;  %v664_v21 = vld [vmem:[#allocation13 + $0xe0] sm:$0xff]  ;;  %v666_v22 = vld [vmem:[#allocation13 + $0xf0] sm:$0xff]  ;;  %v788_v54 = vld [vmem:[#allocation14 + $0xd8] sm:$0xff] }
 0x26c   :  { %v1210_v23 = vpack.c.bf16 %v666_v22, %v664_v21  ;;  %v785_v47 = vld [vmem:[#allocation14 + $0xc0] sm:$0xff]  ;;  %v787_v53 = vld [vmem:[#allocation14 + $0xd0] sm:$0xff] }
 0x26d   :  { %518 = vmatmul.mubr.f32.gmra.mrb[6].mxu0 %v402_v56  ;;  %v435_v56 = vld [vmem:[%s1798_s7] sm:$0x3]  ;;  %v1228_v50 = vpack.c.bf16 %v786_v48, %v785_v47 }
 0x26e   :  { %744 = vmatprep.mubr.f32.mxu0 %v1511_v0  ;;  %1187 = vmatpush1.bf16.msra.mxu0 %v1186_v27  ;;  %v440_v57 = vrot.slane %v435_v56, %v1733_v11  ;;  %v444_v58 = vrot.slane %v435_v56, %v1738_v13  ;;  %v1212_v27 = vpack.c.bf16 %v778_v25, %v777_v24 }
 0x26f   :  { %1189 = vmatprep.subr.bf16.mxu0 %v1188_v28  ;;  %v762_v28 = vld [vmem:[#allocation14 + $0x8] sm:$0xff]  ;;  %v1232_v56 = vpack.c.bf16 %v788_v54, %v787_v53 }
 0x270   :  { %v1214_v31 = vpack.c.bf16 %v762_v28, %v761_v26  ;;  %1213 = vmatprep.subr.bf16.mxu1 %v1212_v27 }
 0x272   :  { %1191 = vmatpush1.bf16.msra.mxu0 %v1190_v33  ;;  %v763_v33 = vld [vmem:[#allocation14 + $0x10] sm:$0xff] }
 0x273   :  { %1193 = vmatprep.subr.bf16.mxu0 %v1192_v34  ;;  %v764_v34 = vld [vmem:[#allocation14 + $0x18] sm:$0xff] }
 0x274   :  { %v1218_v37 = vpack.c.bf16 %v764_v34, %v763_v33 }
 0x276   :  { %1195 = vmatpush1.bf16.msra.mxu0 %v1194_v39  ;;  %v765_v39 = vld [vmem:[#allocation14 + $0x20] sm:$0xff] }
 0x277   :  { %1197 = vmatprep.subr.bf16.mxu0 %v1196_v40  ;;  %v766_v40 = vld [vmem:[#allocation14 + $0x28] sm:$0xff] }
 0x278   :  { %v1222_v43 = vpack.c.bf16 %v766_v40, %v765_v39 }
 0x27a   :  { %1199 = vmatpush1.bf16.msra.mxu0 %v1198_v45  ;;  %v767_v45 = vld [vmem:[#allocation14 + $0x30] sm:$0xff] }
 0x27b   :  { %1201 = vmatprep.subr.bf16.mxu0 %v1200_v46  ;;  %v768_v46 = vld [vmem:[#allocation14 + $0x38] sm:$0xff] }
 0x27c   :  { %v1226_v49 = vpack.c.bf16 %v768_v46, %v767_v45 }
 0x27e   :  { %1203 = vmatpush1.bf16.msra.mxu0 %v1202_v51  ;;  %v769_v51 = vld [vmem:[#allocation14 + $0x40] sm:$0xff] }
 0x27f   :  { %1205 = vmatprep.subr.bf16.mxu0 %v1204_v52  ;;  %v770_v52 = vld [vmem:[#allocation14 + $0x48] sm:$0xff] }
 0x282   :  { %1207 = vmatpush1.bf16.msra.mxu0 %v1206_v55  ;;  %v1230_v55 = vpack.c.bf16 %v770_v52, %v769_v51 }
 0x283   :  { %1209 = vmatprep.subr.bf16.mxu0 %v1208_v20 }
 0x286   :  { %1211 = vmatpush1.bf16.msra.mxu0 %v1210_v23 }
 0x33c   :  { %v513_v59 = vpop.f32.mrb[4].mxu0 }
 0x33d   :  { %v514_v60 = vadd.f32 %v513_v59, %v440_v57  ;;  %v515_v61 = vpop.f32.mrb[5].mxu0  ;;  %v789_v59 = vld [vmem:[#allocation14 + $0xe0] sm:$0xff] }
 0x33e   :  { %v516_v62 = vadd.f32 %v515_v61, %v444_v58 }
 0x33f   :  { %877 = vst [vmem:[#allocation17] sm:$0xff] %v514_v60 }
 0x340   :  { %v524_v63 = vmul.f32 0.5, %v516_v62  ;;  %879 = vst [vmem:[#allocation17 + $0x8] sm:$0xff] %v516_v62  ;;  %v519_v1 = vpop.f32.mrb[6].mxu0 }
 0x341   :  { %v520_v2 = vadd.f32 %v519_v1, %v440_v57  ;;  %v521_v3 = vpop.f32.mrb[7].mxu0  ;;  %v771_v57 = vld [vmem:[#allocation14 + $0x50] sm:$0xff] }
 0x342   :  { %v526_v4 = vmul.f32 1.442695, %v524_v63  ;;  %v522_v5 = vadd.f32 %v521_v3, %v444_v58  ;;  %v772_v58 = vld [vmem:[#allocation14 + $0x58] sm:$0xff]  ;;  %v921_v63 = vld [vmem:[%s1800_s9] ss:$0 sm:$0xff] }
 0x343   :  { %878 = vst [vmem:[#allocation17 + $0x18] sm:$0xff] %v520_v2  ;;  %v1234_v61 = vpack.c.bf16 %v772_v58, %v771_v57 }
 0x344   :  { %1261 = vpow2.f32 %v526_v4  ;;  %v525_v6 = vmul.f32 0.5, %v522_v5  ;;  %880 = vst [vmem:[#allocation17 + $0x20] sm:$0xff] %v522_v5 }
 0x346   :  { %v528_v7 = vmul.f32 1.442695, %v525_v6 }
 0x348   :  { %1263 = vpow2.f32 %v528_v7  ;;  %v773_v7 = vld [vmem:[#allocation14 + $0x60] sm:$0xff] }
 0x34e   :  { %v1262_v9 = vpop.eup %1261 }
 0x34f   :  { %v532_v10 = vmul.f32 %v1262_v9, %v530_v8  ;;  %v774_v8 = vld [vmem:[#allocation14 + $0x68] sm:$0xff] }
 0x350   :  { %v1238_v9 = vpack.c.bf16 %v774_v8, %v773_v7 }
 0x351   :  { %v534_v14 = vadd.f32 %v532_v10, %v514_v60  ;;  %v790_v60 = vld [vmem:[#allocation14 + $0xe8] sm:$0xff]  ;;  %v791_v10 = vld [vmem:[#allocation14 + $0xf0] sm:$0xff] }
 0x352   :  { %v1264_v15 = vpop.eup %1263  ;;  %v1236_v62 = vpack.c.bf16 %v790_v60, %v789_v59 }
 0x353   :  { %1049 = vmatprep.mubr.f32.mxu1 %v534_v14  ;;  %881 = vst [vmem:[#allocation17 + $0x10] sm:$0xff] %v534_v14  ;;  %v533_v16 = vmul.f32 %v1264_v15, %v531_v12  ;;  %v792_v12 = vld [vmem:[#allocation14 + $0xf8] sm:$0xff]  ;;  %v775_v15 = vld [vmem:[#allocation14 + $0x70] sm:$0xff] }
 0x354   :  { %v1240_v14 = vpack.c.bf16 %v792_v12, %v791_v10 }
 0x355   :  { %v535_v17 = vadd.f32 %v533_v16, %v520_v2  ;;  %v776_v16 = vld [vmem:[#allocation14 + $0x78] sm:$0xff] }
 0x357   :  { %1050 = vmatmul.mubr.f32.vlgmr.msra.gmra.mrb[4].mxu1 %v535_v17  ;;  %882 = vst [vmem:[#allocation17 + $0x28] sm:$0xff] %v535_v17  ;;  %v1242_v17 = vpack.c.bf16 %v776_v16, %v775_v15 }
 0x358   :  { %1215 = vmatpush3.bf16.msra.mxu1 %v1214_v31 }
 0x359   :  { %1217 = vmatprep.subr.bf16.mxu1 %v1216_v32 }
 0x35c   :  { %1219 = vmatpush3.bf16.msra.mxu1 %v1218_v37 }
 0x35d   :  { %1221 = vmatprep.subr.bf16.mxu1 %v1220_v38 }
 0x360   :  { %1223 = vmatpush3.bf16.msra.mxu1 %v1222_v43 }
 0x361   :  { %1225 = vmatprep.subr.bf16.mxu1 %v1224_v44 }
 0x364   :  { %1227 = vmatpush3.bf16.msra.mxu1 %v1226_v49 }
 0x365   :  { %1229 = vmatprep.subr.bf16.mxu1 %v1228_v50 }
 0x368   :  { %1231 = vmatpush3.bf16.msra.mxu1 %v1230_v55 }
 0x369   :  { %1233 = vmatprep.subr.bf16.mxu1 %v1232_v56 }
 0x36c   :  { %1235 = vmatpush3.bf16.msra.mxu1 %v1234_v61 }
 0x36d   :  { %1237 = vmatprep.subr.bf16.mxu1 %v1236_v62 }
 0x370   :  { %1239 = vmatpush3.bf16.msra.mxu1 %v1238_v9 }
 0x371   :  { %1241 = vmatprep.subr.bf16.mxu1 %v1240_v14 }
 0x374   :  { %1243 = vmatpush3.bf16.msra.mxu1 %v1242_v17 }
 0x42a   :  { %v1051_v1 = vpop.f32.mrb[4].mxu1 }
 0x42b   :  { %v625_v2 = vpop.f32.mrb[5].mxu1  ;;  %v631_v4 = vadd.f32 %v1051_v1, %v921_v63 }
 0x42c   :  { %v626_v3 = vadd.f32 %v921_v63, %v625_v2 }
 0x42d   :  { %v635_v6 = vmax.f32 %v631_v4, 0.0 }
 0x42e   :  { %v634_v5 = vmax.f32 %v626_v3, 0.0 }
 0x430   :  { %745 = vmatmul.mubr.f32.vlgmr.msra.gmra.mrb[8].mxu0 %v634_v5 }
 0x431   :  { %750 = vmatprep.mubr.f32.mxu0 %v1511_v0  ;;  %v673_v0 = vrot.slane %v668_v18, %v1733_v11 }
 0x434   :  { %751 = vmatmul.mubr.f32.gmra.mrb[10].mxu0 %v635_v6 }
 0x503   :  { %v746_v20 = vpop.f32.mrb[8].mxu0 }
 0x504   :  { %v747_v21 = vadd.f32 %v746_v20, %v673_v0  ;;  %v748_v22 = vpop.f32.mrb[9].mxu0 }
 0x505   :  { %v749_v23 = vadd.f32 %v748_v22, %v677_v19 }
 0x506   :  { %v757_v26 = vmax.f32 %v747_v21, 0.0 }
 0x507   :  { %v758_v24 = vmax.f32 %v749_v23, 0.0  ;;  %v752_v25 = vpop.f32.mrb[10].mxu0 }
 0x508   :  { %v753_v27 = vadd.f32 %v752_v25, %v673_v0  ;;  %v754_v28 = vpop.f32.mrb[11].mxu0 }
 0x509   :  { %v755_v29 = vadd.f32 %v754_v28, %v677_v19  ;;  %864 = vmatprep.mubr.f32.mxu1 %v758_v24 }
 0x50a   :  { %865 = vmatmul.mubr.f32.vlgmr.msra.gmra.mrb[6].mxu1 %v757_v26  ;;  %v759_v31 = vmax.f32 %v753_v27, 0.0 }
 0x50b   :  { %v760_v30 = vmax.f32 %v755_v29, 0.0 }
 0x50d   :  { %869 = vmatprep.mubr.f32.mxu1 %v760_v30 }
 0x50e   :  { %870 = vmatmul.mubr.f32.gmra.mrb[8].mxu1 %v759_v31 }
 0x50f   :  { %1452 = shalt.err (!%p1449_p12)
}
 0x510   :  { %s1453_s18 = scalar_lea.hbm %s1806_s15, 768 }
 0x511   :  { %p1454_p13 = scmp.ne.s32.totalorder %s1806_s15, %s1453_s18  ;;  %p1457_p0 = scmp.lt.u32.totalorder %s1453_s18, %s1806_s15 }
 0x513   :  { %p1459_p1 = pnand %p1457_p0, %p1454_p13 }
 0x515   :  { %1462 = shalt.err (!%p1459_p1)
}
 0x516   :  { %s1513_s24 = smov 384   ;;  %s1514_s25 = smov 24   ;;  %v922_v13 = vld [vmem:[%s1804_s13] ss:$0 sm:$0xff] }
 0x517   :  { %906 = dma.vmem_to_hbm [thread:$0]  %s901_s19, 768, %s1806_s15, [#allocation18], %s1513_s24, %s1513_s24, %s1514_s25  }
 0x518   :  { %s1515_s12 = smov [#allocation16]  }
 0x519   :  { %s888_s20 = sshll.u32 %s1515_s12, 4  ;;  %s889_s20 = int_to_ptr.vmem [resolvable:$true] %s888_s20 }
 0x51a   :  { %s1463_s3 = scalar_lea.vmem %s889_s20, 256  ;;  %p1468_p3 = scmp.lt.s32.totalorder %s889_s20, %s889_s20 }
 0x51b   :  { %p1464_p2 = scmp.ne.s32.totalorder %s889_s20, %s1463_s3  ;;  %p1469_p4 = scmp.lt.s32.totalorder %s1463_s3, %s1463_s3 }
 0x51d   :  { %p1470_p5 = por %p1469_p4, %p1468_p3 }
 0x51f   :  { %p1471_p6 = pnand %p1470_p5, %p1464_p2 }
 0x5dd   :  { %v1011_v11 = vpop.f32.mrb[6].mxu1 }
 0x5de   :  { %v1012_v32 = vpop.f32.mrb[7].mxu1 }
 0x5df   :  { %v1013_v33 = vadd.f32 %v1012_v32, %v1011_v11 }
 0x5e1   :  { %v867_v34 = vadd.f32 %v1013_v33, %v922_v13  ;;  %v1014_v35 = vpop.f32.mrb[8].mxu1 }
 0x5e2   :  { %v1015_v36 = vpop.f32.mrb[9].mxu1 }
 0x5e3   :  { %875 = vst [vmem:[#allocation16] sm:$0xff] %v867_v34  ;;  %v1016_v37 = vadd.f32 %v1015_v36, %v1014_v35 }
 0x5e5   :  { %v872_v38 = vadd.f32 %v1016_v37, %v922_v13 }
 0x5e7   :  { %876 = vst [vmem:[#allocation16 + $0x8] sm:$0xff] %v872_v38 }
 0x5e8   :  { %1474 = shalt.err (!%p1471_p6)
}
 0x5e9   :  { %s1475_s27 = scalar_lea.hbm %s1805_s14, 256 }
 0x5ea   :  { %p1476_p7 = scmp.ne.s32.totalorder %s1805_s14, %s1475_s27  ;;  %p1479_p8 = scmp.lt.u32.totalorder %s1475_s27, %s1805_s14 }
 0x5ec   :  { %p1481_p9 = pnand %p1479_p8, %p1476_p7 }
 0x5ee   :  { %1484 = shalt.err (!%p1481_p9)
}
 0x5ef   :  { %894 = dma.vmem_to_hbm [thread:$0]  %s889_s20, 256, %s1805_s14, [#allocation4], %s1501_s30, %s1501_s30, %s1502_s16  }
 0x5f0   :  { %1495 = dma.done.wait [#allocation4], 256  }
 0x5f1   :  { %1496 = vsyncadd [#allocation4], 4294967040 }
 0x5f2   :  { %1497 = dma.done.wait [#allocation18], 768  }
 0x5f3   :  { %1498 = vsyncadd [#allocation18], 4294966528 }
 0x5f4   :  { %913 = vsyncpa [#allocation3], 1 }
 0x5f5   :  { %914 = vsyncpa [#allocation6], 1 }
 0x5f6   :  { %915 = vsyncpa [#allocation9], 1 }
 0x5f7   :  { %916 = vsyncpa [#allocation12], 1 }
 0x5f8   :  { %917 = vsyncpa [#allocation15], 1 }
 0x5f9   :  { %918 = vsyncpa [#allocation4], 1 }
 0x5fa   :  { %919 = vsyncpa [#allocation18], 1 }

</bundles_post_ra>
